<compile_context>
chip_gen: v6e
topology: v6e:2x2x1
jax: 0.10.0
libtpu: 0.0.40
codegen_flags: <defaults>
</compile_context>

<pallas_src>
import functools
import math

import jax
import jax.numpy as jnp
from jax.experimental import pallas as pl
from jax.experimental.pallas import tpu as pltpu

C_PAD = 128            # lane-dense channel padding for all activations / weights
K_STEM = 16            # stem (1x1 conv) contraction padding: 3 real channels -> 16


def _detect_pair_taps():
    # Pack two 3x3 taps per MXU issue (K=256) on 256-deep-MXU generations (v6e / v7x);
    # keep K=128 per tap on v5e / older (128-deep MXU) and on unknown devices.
    try:
        kind = jax.devices()[0].device_kind.lower()
    except Exception:
        return False
    return ("v6" in kind) or ("v7" in kind)


def _detect_vmem_limit():
    # Generation-aware VMEM budget: ~3/4 of physical (96 MiB on v5e/v6e's 128 MiB,
    # 48 MiB on v7x's 64 MiB), capped at 100 MiB.
    try:
        cap = int(pltpu.get_tpu_info().vmem_capacity_bytes)
    except Exception:
        cap = 64 * 1024 * 1024
    return int(min(100 * 1024 * 1024, cap * 3 // 4))


PAIR_TAPS = _detect_pair_taps()
VMEM_LIMIT = _detect_vmem_limit()


def _compiler_params(n_grid_axes):
    return pltpu.CompilerParams(
        dimension_semantics=("parallel",) * n_grid_axes,
        vmem_limit_bytes=VMEM_LIMIT,
    )


def _tap_groups():
    if PAIR_TAPS:
        # 4 pairs (K=256) + tap 8 paired with a zero weight half (LHS reuses tap 8).
        return ((0, 1), (2, 3), (4, 5), (6, 7), (8, 8))
    return tuple((t,) for t in range(9))


# ----------------------------------------------------------------------------
# In-kernel helpers
# ----------------------------------------------------------------------------
def _pad_ring_mask(m, w_row, h_valid, w_valid):
    # Valid-output mask over the extended conv1 domain, built in-kernel (no lane-sparse
    # HBM input stream).  Row/col are recovered from a flat iota with float ops only
    # (exact for these sizes), avoiding integer vector division.
    idx = jax.lax.broadcasted_iota(jnp.int32, (m, 1), 0).astype(jnp.float32)
    r = jnp.floor((idx + 0.5) * (1.0 / w_row))
    c = idx - r * w_row
    valid = (r >= 1.0) & (r <= float(h_valid)) & (c >= 1.0) & (c <= float(w_valid))
    return valid.astype(jnp.float32)


def _tap_conv(load_tap, w_ref, groups):
    # Sum of shifted bf16 matmuls with f32 accumulation; the accumulator is initialized
    # from the first group's dot result (no zeros fill + add).
    acc = None
    for g, taps in enumerate(groups):
        if len(taps) == 1:
            lhs = load_tap(taps[0])
        else:
            lhs = jnp.concatenate([load_tap(t) for t in taps], axis=-1)
        d = jnp.dot(lhs, w_ref[g], preferred_element_type=jnp.float32)
        acc = d if acc is None else acc + d
    return acc


# ----------------------------------------------------------------------------
# Pallas kernels
# ----------------------------------------------------------------------------
def _stem_kernel(x_ref, w_ref, b_ref, o_ref):
    # 1x1 conv (stem): (tm, K) bf16 @ (K, C) bf16 -> f32 acc -> + bias -> bf16
    y = jnp.dot(x_ref[...], w_ref[...], preferred_element_type=jnp.float32)
    o_ref[...] = (y + b_ref[...]).astype(o_ref.dtype)


def _res_block_kernel(xp_ref, w1_ref, b1_ref, w2_ref, b2_ref, o_ref, *, H, W, groups):
    # Fused ResBlock: conv3x3+BN+ReLU -> conv3x3+BN -> + identity -> ReLU.
    # xp_ref: (Mp, C) bf16 = input zero-padded rows (2,4) / cols (2,2), flattened with
    # row stride Wp = W+4.  Output: (H*Wp, C); columns >= W are garbage (sliced off in
    # the wrapper).
    Wp = W + 4
    M1 = (H + 3) * Wp            # extended conv1 domain == zero-padded conv2 input
    M2 = H * Wp                  # conv2 / output domain

    def load1(t):
        ky, kx = divmod(t, 3)
        return xp_ref[pl.ds(ky * Wp + kx, M1), :]

    acc1 = _tap_conv(load1, w1_ref, groups)
    # mask zeroes the padding ring / garbage columns so it becomes conv2's zero padding
    mask = _pad_ring_mask(M1, Wp, H, W)
    h1 = (jnp.maximum(acc1 + b1_ref[...], 0.0) * mask).astype(jnp.bfloat16)

    def load2(t):
        ky, kx = divmod(t, 3)
        sh = ky * Wp + kx
        return h1[sh:sh + M2, :]

    acc2 = _tap_conv(load2, w2_ref, groups)
    # identity shortcut (center tap of the padded input); only this tap is upcast to f32
    res = xp_ref[pl.ds(2 * Wp + 2, M2), :].astype(jnp.float32)
    o_ref[...] = jnp.maximum(acc2 + b2_ref[...] + res, 0.0).astype(o_ref.dtype)


def _res_block_down_kernel(xph_ref, w1_ref, b1_ref, w2_ref, b2_ref,
                           wsc_ref, bsc_ref, o_ref, *, Ho, Wo, groups):
    # Fused ResBlockDown: conv3x3/s2+BN+ReLU -> conv3x3+BN, shortcut conv1x1/s2+BN, add,
    # ReLU.  xph_ref: (4, Mph, C) bf16 = the 4 stride-2 phases of the padded input, each
    # flattened with row stride Wq = Wo+2.
    Wq = Wo + 2
    M1 = (Ho + 3) * Wq
    M2 = Ho * Wq

    def load1(t):
        ky, kx = divmod(t, 3)
        p = (ky % 2) * 2 + (kx % 2)
        sh = (ky // 2) * Wq + (kx // 2)
        return xph_ref[p, pl.ds(sh, M1), :]

    acc1 = _tap_conv(load1, w1_ref, groups)
    mask = _pad_ring_mask(M1, Wq, Ho, Wo)
    h1 = (jnp.maximum(acc1 + b1_ref[...], 0.0) * mask).astype(jnp.bfloat16)

    def load2(t):
        ky, kx = divmod(t, 3)
        sh = ky * Wq + kx
        return h1[sh:sh + M2, :]

    acc2 = _tap_conv(load2, w2_ref, groups)

    # 1x1 stride-2 shortcut conv + folded BN == phase (1,1) shifted by (1,1)
    sc = jnp.dot(xph_ref[3, pl.ds(Wq + 1, M2), :], wsc_ref[...],
                 preferred_element_type=jnp.float32) + bsc_ref[...]
    o_ref[...] = jnp.maximum(acc2 + b2_ref[...] + sc, 0.0).astype(o_ref.dtype)


# ----------------------------------------------------------------------------
# Pallas-call wrappers
# ----------------------------------------------------------------------------
def stem_conv(x_cols, w, b):
    # x_cols: (B, M, K) bf16, w: (K, C) bf16, b: (1, C) f32 -> (B, M, C) bf16
    B, M, K = x_cols.shape
    C = w.shape[1]
    tm = 512 if M >= 512 else 128
    Mp = pl.cdiv(M, tm) * tm
    if Mp != M:                  # cdiv-based tiling with a zero-padded tail
        x_cols = jnp.pad(x_cols, ((0, 0), (0, Mp - M), (0, 0)))
    cost = pl.CostEstimate(flops=2 * B * Mp * K * C, transcendentals=0,
                           bytes_accessed=2 * B * Mp * (K + C) + 2 * K * C + 4 * C)
    y = pl.pallas_call(
        _stem_kernel,
        out_shape=jax.ShapeDtypeStruct((B, Mp, C), jnp.bfloat16),
        grid=(B, Mp // tm),
        in_specs=[
            pl.BlockSpec((pl.Squeezed(), tm, K), lambda b, m: (b, m, 0)),
            pl.BlockSpec((K, C), lambda b, m: (0, 0)),
            pl.BlockSpec((1, C), lambda b, m: (0, 0)),
        ],
        out_specs=pl.BlockSpec((pl.Squeezed(), tm, C), lambda b, m: (b, m, 0)),
        compiler_params=_compiler_params(2),
        cost_estimate=cost,
    )(x_cols, w, b)
    return y if Mp == M else y[:, :M, :]


def res_block(x, p):
    # x: (B, H, W, C) bf16 -> (B, H, W, C) bf16
    B, H, W, C = x.shape
    Wp = W + 4
    Mp = (H + 6) * Wp
    M1 = (H + 3) * Wp
    M2 = H * Wp
    xp = jnp.pad(x, ((0, 0), (2, 4), (2, 2), (0, 0))).reshape(B, Mp, C)
    groups = _tap_groups()
    kg, kdepth, _ = p["w1"].shape
    cost = pl.CostEstimate(
        flops=2 * B * kg * kdepth * (M1 + M2) * C, transcendentals=0,
        bytes_accessed=2 * B * (Mp + M2) * C + 2 * 2 * kg * kdepth * C + 8 * C)
    out = pl.pallas_call(
        functools.partial(_res_block_kernel, H=H, W=W, groups=groups),
        out_shape=jax.ShapeDtypeStruct((B, M2, C), jnp.bfloat16),
        grid=(B,),
        in_specs=[
            pl.BlockSpec((pl.Squeezed(), Mp, C), lambda b: (b, 0, 0)),
            pl.BlockSpec((kg, kdepth, C), lambda b: (0, 0, 0)),
            pl.BlockSpec((1, C), lambda b: (0, 0)),
            pl.BlockSpec((kg, kdepth, C), lambda b: (0, 0, 0)),
            pl.BlockSpec((1, C), lambda b: (0, 0)),
        ],
        out_specs=pl.BlockSpec((pl.Squeezed(), M2, C), lambda b: (b, 0, 0)),
        compiler_params=_compiler_params(1),
        cost_estimate=cost,
    )(xp, p["w1"], p["b1"], p["w2"], p["b2"])
    return out.reshape(B, H, Wp, C)[:, :, :W, :]


def res_block_down(x, p):
    # x: (B, H, W, C) bf16 -> (B, H/2, W/2, C) bf16
    B, H, W, C = x.shape
    Ho, Wo = H // 2, W // 2
    Wq = Wo + 2
    Hph = Ho + 5
    Mph = Hph * Wq
    M1 = (Ho + 3) * Wq
    M2 = Ho * Wq
    # TODO(synk): this pad + 6-D transpose (4-phase space-to-depth) and the final column
    # slice are XLA glue (extra HBM passes); fold into the kernel via pl.ANY + strided DMA.
    xp = jnp.pad(x, ((0, 0), (3, 7), (3, 1), (0, 0)))            # (B, 2*Hph, 2*Wq, C)
    xph = xp.reshape(B, Hph, 2, Wq, 2, C)
    xph = jnp.transpose(xph, (0, 2, 4, 1, 3, 5)).reshape(B, 4, Mph, C)
    groups = _tap_groups()
    kg, kdepth, _ = p["w1"].shape
    cost = pl.CostEstimate(
        flops=2 * B * (kg * kdepth * (M1 + M2) + M2 * C) * C, transcendentals=0,
        bytes_accessed=2 * B * (4 * Mph + M2) * C + 2 * (2 * kg * kdepth + C) * C + 12 * C)
    out = pl.pallas_call(
        functools.partial(_res_block_down_kernel, Ho=Ho, Wo=Wo, groups=groups),
        out_shape=jax.ShapeDtypeStruct((B, M2, C), jnp.bfloat16),
        grid=(B,),
        in_specs=[
            pl.BlockSpec((pl.Squeezed(), 4, Mph, C), lambda b: (b, 0, 0, 0)),
            pl.BlockSpec((kg, kdepth, C), lambda b: (0, 0, 0)),
            pl.BlockSpec((1, C), lambda b: (0, 0)),
            pl.BlockSpec((kg, kdepth, C), lambda b: (0, 0, 0)),
            pl.BlockSpec((1, C), lambda b: (0, 0)),
            pl.BlockSpec((C, C), lambda b: (0, 0)),
            pl.BlockSpec((1, C), lambda b: (0, 0)),
        ],
        out_specs=pl.BlockSpec((pl.Squeezed(), M2, C), lambda b: (b, 0, 0)),
        compiler_params=_compiler_params(1),
        cost_estimate=cost,
    )(xph, p["w1"], p["b1"], p["w2"], p["b2"], p["wsc"], p["bsc"])
    return out.reshape(B, Ho, Wq, C)[:, :, :Wo, :]


# ----------------------------------------------------------------------------
# Glue: patchify / unpatchify / random masking (plain JAX)
# ----------------------------------------------------------------------------
def patchify(imgs, p):
    N, C, H, W = imgs.shape
    h = w = H // p
    x = imgs.reshape(N, 3, h, p, w, p)
    x = jnp.transpose(x, (0, 2, 4, 3, 5, 1))  # nchpwq -> nhwpqc
    return x.reshape(N, h * w, p * p * 3)


def unpatchify(x, p):
    N = x.shape[0]
    h = w = int(round(x.shape[1] ** 0.5))
    x = x.reshape(N, h, w, p, p, 3)
    x = jnp.transpose(x, (0, 5, 1, 3, 2, 4))  # nhwpqc -> nchpwq
    return x.reshape(N, 3, h * p, h * p)


def apply_mask(imgs, mask_ratio, cls_token, mask_token, key, p):
    x = patchify(imgs, p)
    N, L, D = x.shape
    len_keep = int(L * (1 - mask_ratio))

    noise = jax.random.uniform(key, (N, L))
    ids_shuffle = jnp.argsort(noise, axis=1)
    ids_restore = jnp.argsort(ids_shuffle, axis=1)
    ids_keep = ids_shuffle[:, :len_keep]
    x_masked = jnp.take_along_axis(x, ids_keep[:, :, None], axis=1)
    mask = jnp.ones((N, L), dtype=jnp.float32).at[:, :len_keep].set(0.0)
    mask = jnp.take_along_axis(mask, ids_restore, axis=1)

    cls_tokens = jnp.broadcast_to(cls_token, (N, 1, D))
    xc = jnp.concatenate([cls_tokens, x_masked], axis=1)
    mask_tokens = jnp.broadcast_to(mask_token, (N, L + 1 - xc.shape[1], D))
    x_ = jnp.concatenate([xc[:, 1:, :], mask_tokens], axis=1)
    x_ = jnp.take_along_axis(x_, ids_restore[:, :, None], axis=1)
    x_full = jnp.concatenate([xc[:, :1, :], x_], axis=1)[:, 1:, :]
    return unpatchify(x_full, p), mask, ids_restore, len_keep


# ----------------------------------------------------------------------------
# Deterministic parameter construction (shapes follow the PyTorch module)
# ----------------------------------------------------------------------------
def _xavier_conv(key, cout, cin, k):
    fan_in, fan_out = cin * k * k, cout * k * k
    limit = math.sqrt(6.0 / (fan_in + fan_out))
    return jax.random.uniform(key, (cout, cin, k, k), minval=-limit, maxval=limit,
                              dtype=jnp.float32)


def conv3_taps(key, cin, cout):
    # (Cout, Cin, 3, 3) -> (9, Cin, Cout) with tap index t = ky*3 + kx
    w = _xavier_conv(key, cout, cin, 3)
    return jnp.transpose(w, (2, 3, 1, 0)).reshape(9, cin, cout)


def conv1_mat(key, cin, cout):
    w = _xavier_conv(key, cout, cin, 1)
    return jnp.transpose(w, (2, 3, 1, 0)).reshape(cin, cout)


def bn_fold(key, c):
    # TODO(synk): eval-mode BN folded from synthetic running stats (not train-mode stats).
    k1, k2, k3, k4 = jax.random.split(key, 4)
    gamma = 1.0 + 0.1 * jax.random.normal(k1, (c,))
    beta = 0.1 * jax.random.normal(k2, (c,))
    mean = 0.1 * jax.random.normal(k3, (c,))
    var = 1.0 + 0.1 * jax.random.uniform(k4, (c,))
    scale = gamma / jnp.sqrt(var + 1e-5)
    bias = beta - mean * scale
    return scale.astype(jnp.float32), bias.astype(jnp.float32)


def _pack_tap_groups(w9_full):
    # w9_full: (9, C_PAD, C_PAD) f32, BN-folded & channel-padded.
    if not PAIR_TAPS:
        return w9_full.astype(jnp.bfloat16)                         # (9, C, C)
    gs = [jnp.concatenate([w9_full[a], w9_full[b]], axis=0)
          for a, b in ((0, 1), (2, 3), (4, 5), (6, 7))]
    gs.append(jnp.concatenate([w9_full[8], jnp.zeros_like(w9_full[8])], axis=0))
    return jnp.stack(gs).astype(jnp.bfloat16)                       # (5, 2C, C)


def _fold_pad_taps(w9, scale, cp):
    t, cin, cout = w9.shape
    full = jnp.zeros((t, cp, cp), jnp.float32).at[:, :cin, :cout].set(
        w9 * scale[None, None, :])
    return _pack_tap_groups(full)


def _fold_pad_mat(w, scale, cp_in, cp_out):
    cin, cout = w.shape
    out = jnp.zeros((cp_in, cp_out), jnp.float32).at[:cin, :cout].set(w * scale[None, :])
    return out.astype(jnp.bfloat16)


def _pad_bias(b, cp):
    return jnp.zeros((1, cp), jnp.float32).at[0, :b.shape[0]].set(b)


def make_params(key, img_channels, hidden, n_layers, patch):
    keys = iter(jax.random.split(key, 8 + 16 * max(1, n_layers)))
    ones = jnp.ones((hidden,), jnp.float32)
    params = {
        "cls_token": 0.02 * jax.random.normal(next(keys), (1, 1, 3 * patch * patch)),
        "mask_token": 0.02 * jax.random.normal(next(keys), (1, 1, 3 * patch * patch)),
        "stem_w": _fold_pad_mat(conv1_mat(next(keys), img_channels, hidden),
                                ones, K_STEM, C_PAD),
        "stem_b": jnp.zeros((1, C_PAD), jnp.float32),   # conv bias init = 0
        "hidden": hidden,
        "layers": [],
    }
    for _ in range(n_layers):
        s1, b1 = bn_fold(next(keys), hidden)
        s2, b2 = bn_fold(next(keys), hidden)
        ssc, bsc = bn_fold(next(keys), hidden)
        down = {
            "w1": _fold_pad_taps(conv3_taps(next(keys), hidden, hidden), s1, C_PAD),
            "b1": _pad_bias(b1, C_PAD),
            "w2": _fold_pad_taps(conv3_taps(next(keys), hidden, hidden), s2, C_PAD),
            "b2": _pad_bias(b2, C_PAD),
            "wsc": _fold_pad_mat(conv1_mat(next(keys), hidden, hidden), ssc, C_PAD, C_PAD),
            "bsc": _pad_bias(bsc, C_PAD),
        }
        s1r, b1r = bn_fold(next(keys), hidden)
        s2r, b2r = bn_fold(next(keys), hidden)
        res = {
            "w1": _fold_pad_taps(conv3_taps(next(keys), hidden, hidden), s1r, C_PAD),
            "b1": _pad_bias(b1r, C_PAD),
            "w2": _fold_pad_taps(conv3_taps(next(keys), hidden, hidden), s2r, C_PAD),
            "b2": _pad_bias(b2r, C_PAD),
        }
        params["layers"].append({"down": down, "res": res})
    return params


# ----------------------------------------------------------------------------
# Backbone + full forward
# ----------------------------------------------------------------------------
def forward_backbone(x_nhwc, params):
    B, H, W, cin = x_nhwc.shape
    # stem: 1x1 conv (no BN / ReLU); 3 real input channels padded only to K_STEM=16
    x_p = jnp.pad(x_nhwc, ((0, 0), (0, 0), (0, 0), (0, K_STEM - cin))).astype(jnp.bfloat16)
    y = stem_conv(x_p.reshape(B, H * W, K_STEM), params["stem_w"], params["stem_b"])
    x = y.reshape(B, H, W, C_PAD)
    for layer in params["layers"]:
        x = res_block_down(x, layer["down"])
        x = res_block(x, layer["res"])
    return x   # (B, H/ps, W/ps, C_PAD) bf16, channels zero beyond hidden


def sparse_encoder_forward(imgs_nchw, params, mask_key, patch, mask_ratio=0.75):
    x_masked, mask, ids_restore, len_keep = apply_mask(
        imgs_nchw, mask_ratio, params["cls_token"], params["mask_token"], mask_key, patch)
    x_nhwc = jnp.transpose(x_masked, (0, 2, 3, 1))           # NCHW -> NHWC
    feat = forward_backbone(x_nhwc, params)                  # (B, h, w, C_PAD)
    B, h, w, _ = feat.shape
    hidden = params["hidden"]
    tokens = feat.reshape(B, h * w, C_PAD)[:, :, :hidden].astype(jnp.float32)
    # x[keep_mask.bool(), :].reshape(b, -1, c): static-size gather of unmasked rows
    keep_idx = jnp.argsort(mask, axis=1, stable=True)[:, :len_keep]
    out = jnp.take_along_axis(tokens, keep_idx[:, :, None], axis=1)
    return out, mask, ids_restore


# ----------------------------------------------------------------------------
if __name__ == "__main__":
    B, IMG_C, IMG_HW = 2, 3, 16
    PATCH = 4                       # n_layers = log2(4) = 2
    HIDDEN = 32
    MASK_RATIO = 0.75

    root = jax.random.PRNGKey(0)
    k_param, k_data, k_mask = jax.random.split(root, 3)

    params = make_params(k_param, IMG_C, HIDDEN, int(math.log2(PATCH)), PATCH)
    x = jax.random.normal(k_data, (B, IMG_C, IMG_HW, IMG_HW), dtype=jnp.float32)

    out, mask, ids_restore = sparse_encoder_forward(x, params, k_mask, PATCH, MASK_RATIO)
    out = jax.block_until_ready(out)
    mask = jax.block_until_ready(mask)
    ids_restore = jax.block_until_ready(ids_restore)

    assert out.shape == (B, int((IMG_HW // PATCH) ** 2 * (1 - MASK_RATIO)), HIDDEN)
    assert mask.shape == (B, (IMG_HW // PATCH) ** 2)
    assert ids_restore.shape == (B, (IMG_HW // PATCH) ** 2)
    assert bool(jnp.all(jnp.isfinite(out)))
    print("KERNEL_OK")
</pallas_src>

<mosaic_0001>
module attributes {stable_mosaic.version = 11 : i64} {
  func.func @_stem_kernel(%arg0: i32, %arg1: i32, %arg2: memref<1x128x16xbf16, #tpu.memory_space<vmem>>, %arg3: memref<16x128xbf16, #tpu.memory_space<vmem>>, %arg4: memref<1x128xf32, #tpu.memory_space<vmem>>, %arg5: memref<1x128x128xbf16, #tpu.memory_space<vmem>>) attributes {dimension_semantics = [#tpu.dimension_semantics<parallel>, #tpu.dimension_semantics<parallel>], iteration_bounds = array<i64: 2, 2>, scalar_prefetch = 0 : i64, scratch_operands = 0 : i64, tpu.core_type = #tpu.core_type<tc>, window_params = [{transform_indices = @transform_0, window_bounds = array<i64: 1, 128, 16>}, {pipeline_mode = #tpu.pipeline_mode<synchronous>, transform_indices = @transform_1, window_bounds = array<i64: 16, 128>}, {pipeline_mode = #tpu.pipeline_mode<synchronous>, transform_indices = @transform_2, window_bounds = array<i64: 1, 128>}, {transform_indices = @transform_3, window_bounds = array<i64: 1, 128, 128>}]} {
    %c0 = arith.constant 0 : index
    %c0_0 = arith.constant 0 : index
    %c0_1 = arith.constant 0 : index
    %0 = vector.load %arg2[%c0, %c0_0, %c0_1] : memref<1x128x16xbf16, #tpu.memory_space<vmem>>, vector<1x128x16xbf16>
    %1 = vector.shape_cast %0 : vector<1x128x16xbf16> to vector<128x16xbf16>
    %c0_2 = arith.constant 0 : index
    %c0_3 = arith.constant 0 : index
    %2 = vector.load %arg3[%c0_2, %c0_3] : memref<16x128xbf16, #tpu.memory_space<vmem>>, vector<16x128xbf16>
    %cst = arith.constant dense<0.000000e+00> : vector<128x128xf32>
    %3 = tpu.matmul %1, %2, %cst {dimension_numbers = #tpu.dot_dimension_numbers<[1], [0], [0], [1], [0, 0, 1, 1], [], []>} : vector<128x16xbf16>, vector<16x128xbf16>, vector<128x128xf32> -> vector<128x128xf32>
    %c0_4 = arith.constant 0 : index
    %c0_5 = arith.constant 0 : index
    %4 = vector.load %arg4[%c0_4, %c0_5] : memref<1x128xf32, #tpu.memory_space<vmem>>, vector<1x128xf32>
    %5 = vector.broadcast %4 : vector<1x128xf32> to vector<128x128xf32>
    %6 = arith.addf %3, %5 : vector<128x128xf32>
    %7 = arith.truncf %6 : vector<128x128xf32> to vector<128x128xbf16>
    %c0_6 = arith.constant 0 : index
    %c0_7 = arith.constant 0 : index
    %c0_8 = arith.constant 0 : index
    %8 = vector.load %arg5[%c0_6, %c0_7, %c0_8] : memref<1x128x128xbf16, #tpu.memory_space<vmem>>, vector<1x128x128xbf16>
    %9 = vector.shape_cast %8 : vector<1x128x128xbf16> to vector<128x128xbf16>
    %10 = vector.shape_cast %7 : vector<128x128xbf16> to vector<1x128x128xbf16>
    tpu.vector_store %arg5[%c0_6, %c0_7, %c0_8], %10 {strides = array<i32>} : memref<1x128x128xbf16, #tpu.memory_space<vmem>>, vector<1x128x128xbf16>,
    return
  }
  func.func @transform_0(%arg0: i32, %arg1: i32) -> (i32, i32, i32) {
    %c0_i32 = arith.constant 0 : i32
    %c0_i32_0 = arith.constant 0 : i32
    return %arg0, %arg1, %c0_i32 : i32, i32, i32
  }
  func.func @transform_1(%arg0: i32, %arg1: i32) -> (i32, i32) {
    %c0_i32 = arith.constant 0 : i32
    %c0_i32_0 = arith.constant 0 : i32
    %c0_i32_1 = arith.constant 0 : i32
    return %c0_i32, %c0_i32_0 : i32, i32
  }
  func.func @transform_2(%arg0: i32, %arg1: i32) -> (i32, i32) {
    %c0_i32 = arith.constant 0 : i32
    %c0_i32_0 = arith.constant 0 : i32
    %c0_i32_1 = arith.constant 0 : i32
    return %c0_i32, %c0_i32_0 : i32, i32
  }
  func.func @transform_3(%arg0: i32, %arg1: i32) -> (i32, i32, i32) {
    %c0_i32 = arith.constant 0 : i32
    %c0_i32_0 = arith.constant 0 : i32
    return %arg0, %arg1, %c0_i32 : i32, i32, i32
  }
}

</mosaic_0001>

<bundles_post_ra>
// kernel: tpu_custom_call.1
= control target key start
LH: loop header
LB: loop body
LE: loop exit
PB: predicated region body
PF: predicated region fallthrough
CT: control target
= control target key end

     0   :  { %8 = vsyncpa [#allocation3], 0  ;;  %s1083_s0 = inlined_call_operand.vmem [shape: bf16[2,256,16], index: 0, kind: input, shape index: {}]   ;;  %s1084_s1 = inlined_call_operand.vmem [shape: bf16[16,128], index: 1, kind: input, shape index: {}]   ;;  %s1085_s2 = inlined_call_operand.vmem [shape: f32[1,128], index: 2, kind: input, shape index: {}]   ;;  %s1086_s3 = inlined_call_operand.hbm [shape: bf16[2,256,128], index: 3, kind: output, shape index: {}]  }
   0x1   :  { %10 = vsyncpa [#allocation3 + $0x1], 0  ;;  %s912_s12 = smov 0   ;;  %s914_s13 = smov 0  }
   0x2   :  { %s916_s14 = smov 0   ;;  %s918_s15 = smov 0  }
   0x3   :  { %s920_s16 = smov 0   ;;  %s922_s17 = smov 0  }
   0x4   :  { %s924_s18 = smov 0   ;;  %s926_s19 = smov 0  }
   0x5 LB: > { %s572_s20 = sadd.s32 4294967295, %s887_s19   ;;  %s573_s21 = sadd.s32 4294967294, %s887_s19   ;;  %s887_s19 = sphi %s926_s19, %s16_s19   ;;  %s883_s18 = sphi %s924_s18, %s1095_s18   ;;  %s879_s17 = sphi %s922_s17, %s1094_s17   ;;  %s875_s16 = sphi %s920_s16, %s1093_s16   ;;  %s871_s15 = sphi %s918_s15, %s1092_s15   ;;  %s867_s14 = sphi %s916_s14, %s1091_s14   ;;  %s863_s13 = sphi %s914_s13, %s1090_s13   ;;  %s859_s12 = sphi %s912_s12, %s1089_s12  }
   0x6   : > { %s25_s22 = sadd.s32 1, %s879_s17  ;;  %s28_s23 = sadd.s32 1, %s883_s18 }
   0x7   : > { %p26_p0 = scmp.ge.s32.totalorder %s25_s22, 2  ;;  %p117_p1 = scmp.ne.s32.totalorder %s867_s14, %s863_s13 }
   0x8   : > { %p118_p2 = scmp.eq.s32.totalorder %s572_s20, 3  ;;  %p123_p5 = scmp.ne.s32.totalorder %s863_s13, %s859_s12 }
   0x9   : > { %s1097_s22 = smov (%p26_p0, %s25_s22), 0  ;;  %s1099_s23 = smov (!%p26_p0, %s28_s23), %s883_s18 }
   0xa   : > { %s103_s24 = ssub.s32 %s879_s17, %s1097_s22  ;;  %p963_p3 = por %p118_p2, %p117_p1 }
   0xb   : > { %p30_p4 = scmp.ge.s32.totalorder %s1099_s23, 2  ;;  %p124_p6 = scmp.eq.s32.totalorder %s573_s21, 3 }
   0xc   : > { %p576_p7 = scmp.ge.s32.totalorder %s887_s19, 1  ;;  %p161_p9 = scmp.lt.s32.totalorder %s887_s19, 5 }
   0xd   : > { %s1101_s23 = smov (%p30_p4, %s1099_s23), 0  ;;  %p972_p8 = por %p124_p6, %p123_p5 }
   0xe   : > { %s102_s27 = ssub.s32 %s883_s18, %s1101_s23  ;;  %s107_s28 = sadd.s32 1, %s867_s14 }
   0xf   : > { %s104_s29 = sor.u32 %s103_s24, %s102_s27  ;;  %p162_p10 = pnand %p576_p7, %p161_p9 }
  0x10   : > { %p105_p11 = scmp.eq.s32.totalorder %s104_s29, 0  ;;  %s987_s6 = sshll.u32 (!%p162_p10), %s871_s15, 4 }
  0x11   : > { %165 = sbr.rel (%p162_p10) target bundleno = 256 (0x100), region = 32  ;;  %p190_p12 = scmp.lt.s32.totalorder (!%p162_p10), %s875_s16, 1 }
  0x12   : > { %s981_s30 = scalar_select %p105_p11, %s867_s14, %s107_s28  }
  0x13   : > { %p192_p13 = scmp.lt.s32.totalorder (!%p162_p10), %s987_s6, 31  ;;  %s186_s15 = sand.u32 (!%p162_p10), 1, %s863_s13  }
  0x14   : > { %s577_s29 = sshll.u32 (!%p162_p10), %s186_s15, 6  ;;  %s617_s4 = sshll.u32 (!%p162_p10), %s875_s16, 5 }
  0x15   : > { %s1011_s5 = scalar_lea.vmem (!%p162_p10), [#allocation2], %s577_s29  ;;  %s889_s21 = smov (!%p162_p10), [#allocation2]  }
  0x16   : > { %v786_v0 = vld [vmem:[%s1084_s1] sm:$0xff]   ;;  %s191_s7 = scalar_select %p190_p12, %s875_s16, 1  ;;  %vm272_vm0 = vcmask 130048  }
  0x17   : > { %693 = vmatprep.subr.bf16.mxu0 %v786_v0  ;;  %711 = vmatprep.subr.bf16.mxu1 %v786_v0  ;;  %s193_s8 = scalar_select %p192_p13, %s987_s6, 31  ;;  %v581_v11 = vld [vmem:[%s1085_s2] ss:$0 sm:$0xff] }
  0x18   : > { %694 = vmatpush3.bf16.msra.mxu0 %v786_v0  ;;  %712 = vmatpush3.bf16.msra.mxu1 %v786_v0  ;;  %s579_s9 = sshll.u32 %s191_s7, 5  ;;  %s487_s7 = sadd.s32 %s617_s4, %s987_s6 }
  0x19   : > { %s195_s10 = sadd.s32 %s579_s9, %s193_s8  ;;  %s618_s16 = sshll.u32 %s487_s7, 6 }
  0x1a   : > { %s580_s11 = sshll.u32 %s195_s10, 2  ;;  %s490_s8 = sshll.u32 %s1011_s5, 4  ;;  %s1025_s8 = int_to_ptr.vmem [resolvable:$true] %s490_s8 }
  0x1b   : > { %s197_s24 = scalar_lea.vmem %s1083_s0, %s580_s11  ;;  %s1023_s10 = scalar_lea.hbm %s1086_s3, %s618_s16 }
  0x1c   : > { %v787_v1 = vld [vmem:[%s197_s24] sm:$0xff]   ;;  %v789_v3 = vld [vmem:[%s197_s24 + $0x8] sm:$0xff]   ;;  %v791_v5 = vld [vmem:[%s197_s24 + $0x10] sm:$0xff]   ;;  %s1032_s11 = scalar_lea.sflag [#allocation3], %s186_s15  ;;  %s795_s20 = scalar_lea.vmem %s1025_s8, 1024 }
  0x1d   : > { %v788_v2 = vld [vmem:[%s197_s24 + $0x20] sm:$0xff]   ;;  %695 = vmatprep.mubr.msk.bf16.mxu0 %vm272_vm0, %v787_v1  ;;  %v790_v4 = vld [vmem:[%s197_s24 + $0x28] sm:$0xff]   ;;  %v792_v6 = vld [vmem:[%s197_s24 + $0x30] sm:$0xff]   ;;  %p796_p0 = scmp.ne.s32.totalorder %s1025_s8, %s795_s20 }
  0x1e   : > { %703 = vmatprep.mubr.msk.bf16.mxu1 %vm272_vm0, %v788_v2  ;;  %696 = vmatmul.mubr.msk.bf16.vlgmr.msra.gmra.mxu0 %vm272_vm0, %v789_v3  ;;  %v793_v7 = vld [vmem:[%s197_s24 + $0x18] sm:$0xff]  }
  0x1f   : > { %704 = vmatmul.mubr.msk.bf16.vlgmr.msra.gmra.mxu1 %vm272_vm0, %v790_v4  ;;  %699 = vmatprep.mubr.msk.bf16.mxu0 %vm272_vm0, %v791_v5  ;;  %v794_v8 = vld [vmem:[%s197_s24 + $0x38] sm:$0xff]   ;;  %p797_p1 = pnand %p796_p0, %p963_p3  ;;  %s799_s24 = sshll.u32 %s889_s21, 4  ;;  %s800_s24 = int_to_ptr.vmem [resolvable:$false] %s799_s24 }
  0x20   : > { %707 = vmatprep.mubr.msk.bf16.mxu1 %vm272_vm0, %v792_v6  ;;  %s801_s27 = scalar_lea.vmem %s800_s24, 2048  ;;  %p802_p4 = scmp.lt.s32.totalorder %s1025_s8, %s800_s24 }
  0x21   : > { %p798_p2 = pneg %p797_p1  ;;  %p803_p5 = scmp.lt.s32.totalorder %s801_s27, %s795_s20 }
  0x23   : > { %p804_p6 = por %p803_p5, %p802_p4 }
  0x25   : > { %p805_p7 = pnand %p804_p6, %p798_p2 }
  0x26   : > { %700 = vmatmul.mubr.msk.bf16.gmra.mxu0 %vm272_vm0, %v793_v7 }
  0x27   : > { %708 = vmatmul.mubr.msk.bf16.gmra.mxu1 %vm272_vm0, %v794_v8 }
  0xde   : > { %v697_v9 = vpop.f32.mrf.mxu0 }
  0xdf   : > { %v705_v10 = vpop.f32.mrf.mxu1  ;;  %v340_v15 = vadd.f32 %v697_v9, %v581_v11 }
  0xe0   : > { %v331_v12 = vpop.f32.mrf.mxu0  ;;  %v372_v18 = vadd.f32 %v705_v10, %v581_v11 }
  0xe1   : > { %v363_v13 = vpop.f32.mrf.mxu1  ;;  %v332_v21 = vadd.f32 %v581_v11, %v331_v12 }
  0xe2   : > { %v698_v14 = vpop.f32.mrf.mxu0  ;;  %v364_v25 = vadd.f32 %v581_v11, %v363_v13 }
  0xe3   : > { %v343_v16 = vadd.f32 %v698_v14, %v581_v11  ;;  %v706_v17 = vpop.f32.mrf.mxu1 }
  0xe4   : > { %v375_v19 = vadd.f32 %v706_v17, %v581_v11  ;;  %v334_v20 = vpop.f32.mrf.mxu0 }
  0xe5   : > { %v645_v22 = vpack.c.bf16 %v343_v16, %v340_v15  ;;  %v335_v23 = vadd.f32 %v581_v11, %v334_v20  ;;  %v366_v24 = vpop.f32.mrf.mxu1 }
  0xe6   : > { %v665_v26 = vpack.c.bf16 %v375_v19, %v372_v18  ;;  %v367_v27 = vadd.f32 %v581_v11, %v366_v24  ;;  %v701_v28 = vpop.f32.mrf.mxu0 }
  0xe7   : > { %677 = vst [vmem:[%s1011_s5 + $0x8] sm:$0xff] %v645_v22   ;;  %v640_v29 = vpack.c.bf16 %v335_v23, %v332_v21  ;;  %v709_v30 = vpop.f32.mrf.mxu1  ;;  %v356_v35 = vadd.f32 %v701_v28, %v581_v11 }
  0xe8   : > { %681 = vst [vmem:[%s1011_s5 + $0x28] sm:$0xff] %v665_v26   ;;  %v660_v31 = vpack.c.bf16 %v367_v27, %v364_v25  ;;  %v347_v32 = vpop.f32.mrf.mxu0  ;;  %v388_v38 = vadd.f32 %v709_v30, %v581_v11 }
  0xe9   : > { %641 = vst [vmem:[%s1011_s5] sm:$0xff] %v640_v29   ;;  %v379_v33 = vpop.f32.mrf.mxu1  ;;  %v348_v41 = vadd.f32 %v581_v11, %v347_v32 }
  0xea   : > { %680 = vst [vmem:[%s1011_s5 + $0x20] sm:$0xff] %v660_v31   ;;  %v702_v34 = vpop.f32.mrf.mxu0  ;;  %v380_v45 = vadd.f32 %v581_v11, %v379_v33 }
  0xeb   : > { %v359_v36 = vadd.f32 %v702_v34, %v581_v11  ;;  %v710_v37 = vpop.f32.mrf.mxu1 }
  0xec   : > { %v391_v39 = vadd.f32 %v710_v37, %v581_v11  ;;  %v350_v40 = vpop.f32.mrf.mxu0 }
  0xed   : > { %v655_v42 = vpack.c.bf16 %v359_v36, %v356_v35  ;;  %v351_v43 = vadd.f32 %v581_v11, %v350_v40  ;;  %v382_v44 = vpop.f32.mrf.mxu1 }
  0xee   : > { %v675_v46 = vpack.c.bf16 %v391_v39, %v388_v38  ;;  %v383_v47 = vadd.f32 %v581_v11, %v382_v44 }
  0xef   : > { %679 = vst [vmem:[%s1011_s5 + $0x18] sm:$0xff] %v655_v42   ;;  %v650_v48 = vpack.c.bf16 %v351_v43, %v348_v41 }
  0xf0   : > { %683 = vst [vmem:[%s1011_s5 + $0x38] sm:$0xff] %v675_v46   ;;  %v670_v49 = vpack.c.bf16 %v383_v47, %v380_v45 }
  0xf1   : > { %678 = vst [vmem:[%s1011_s5 + $0x10] sm:$0xff] %v650_v48  }
  0xf2   : > { %682 = vst [vmem:[%s1011_s5 + $0x30] sm:$0xff] %v670_v49  }
  0xf3   : > { %808 = shalt.err (!%p805_p7)
}
  0xf4   : > { %s809_s15 = scalar_lea.hbm %s1023_s10, 1024  ;;  %s813_s4 = scalar_lea.hbm %s1086_s3, 4096 }
  0xf5   : > { %p810_p9 = scmp.ne.s32.totalorder %s1023_s10, %s809_s15  ;;  %p814_p12 = scmp.lt.s32.totalorder %s1023_s10, %s1086_s3 }
  0xf6   : > { %p815_p13 = scmp.lt.s32.totalorder %s813_s4, %s809_s15 }
  0xf7   : > { %p811_p10 = pnand %p810_p9, %p963_p3 }
  0xf8   : > { %p816_p0 = por %p815_p13, %p814_p12 }
  0xf9   : > { %p812_p11 = pneg %p811_p10 }
  0xfb   : > { %p817_p1 = pnand %p816_p0, %p812_p11 }
  0xfd   : > { %820 = shalt.err (!%p817_p1)
}
  0xfe   : > { %s890_s16 = smov 64   ;;  %s891_s6 = smov 4  }
  0xff   : > { %713 = dma.vmem_to_hbm [thread:$0]  (%p963_p3), %s1025_s8, 1024, %s1023_s10, %s1032_s11, %s890_s16, %s890_s16, %s891_s6  }
 0x100 PF: > { %p719_p2 = scmp.ge.s32.totalorder %s887_s19, 2  ;;  %s505_s9 = sand.u32 1, %s859_s12  }
 0x101   : > { %s506_s20 = scalar_lea.sflag [#allocation3], %s505_s9 }
 0x102   : > { %p716_p4 = pnand %p719_p2, %p972_p8 }
 0x104   : > { %p717_p5 = pneg %p716_p4 }
 0x106   : > { %854 = dma.done.wait (%p717_p5), %s506_s20, 1024  }
 0x107   : > { %856 = vsyncadd (%p717_p5), %s506_s20, 4294966272  ;;  %s16_s19 = sadd.s32 1, %s887_s19   ;;  %s1089_s12 = smov %s863_s13 }
 0x108   : > { %p13_p6 = scmp.ge.s32.totalorder %s16_s19, 6   ;;  %s1090_s13 = smov %s867_s14 }
 0x109   : > { %s1091_s14 = smov %s981_s30  ;;  %s1092_s15 = smov %s879_s17 }
 0x10a   : > { %s1093_s16 = smov %s883_s18  ;;  %s1094_s17 = smov %s1097_s22 }
 0x10b   : > { %s1095_s18 = smov %s1101_s23  ;;  %15 = sbr.rel (!%p13_p6) target bundleno = 5 (0x5), region = 67 }
 0x110   :  { %511 = vsyncpa [#allocation3], 1 }
 0x111   :  { %513 = vsyncpa [#allocation3 + $0x1], 1 }

</bundles_post_ra>
